<compile_context>
chip_gen: v7x
topology: tpu7x:2x2x1
jax: 0.10.0
libtpu: 0.0.40
codegen_flags: <defaults>
</compile_context>

<pallas_src>
import jax
import jax.numpy as jnp
from jax.experimental import pallas as pl
from jax.experimental.pallas import tpu as pltpu

_CHUNK = 8  # sublane chunk size for the incremental H reduction


def _mlp_kernel(x_ref, p_ref, o_ref):
    """Fused 2-layer MLP, specialized for F == O == 1.

    x_ref : (1, Bt)  f32   batch on the lane axis
    p_ref : (Hp, 4)  f32   packed params: [:,0]=w1  [:,1]=b1  [:,2]=w2  [0,3]=b2
    o_ref : (1, Bt)  f32
    """
    x_row = x_ref[...]                        # (1, Bt)
    hp = p_ref.shape[0]                       # static
    n_chunks = hp // _CHUNK                   # static

    def body(c, acc):
        r = pl.multiple_of(c * _CHUNK, _CHUNK)
        chunk = p_ref[pl.ds(r, _CHUNK), :]    # (_CHUNK, 4) -- one small vld
        w1 = chunk[:, 0:1]                    # (_CHUNK, 1)
        b1 = chunk[:, 1:2]
        w2 = chunk[:, 2:3]
        # Layer 1 (K = F = 1): VPU broadcast outer product + bias + ReLU.
        h = jnp.maximum(w1 * x_row + b1, 0.0)            # (_CHUNK, Bt)
        # Layer 2 (O = 1): partial contraction over this sublane chunk (XLU).
        return acc + jnp.sum(w2 * h, axis=0, keepdims=True)   # (1, Bt)

    acc0 = jnp.zeros_like(x_row)
    acc = jax.lax.fori_loop(0, n_chunks, body, acc0, unroll=True)
    # b2 lives at p[0, 3]; (1,1) broadcast along lanes is free in the VALU chain.
    o_ref[...] = (acc + p_ref[0:1, 3:4]).astype(o_ref.dtype)


def net_forward(x, w1, b1, w2, b2, *, lane_tile=2048):
    """Forward pass of Net.

    x : (B, F) f32   (F must be 1, as in the reference script)
    w1: (F, H) f32   b1: (1, H) f32
    w2: (H, O) f32   b2: (1, O) f32   (O must be 1)
    returns (B, O) f32
    """
    B, F = x.shape
    H = w1.shape[1]
    O = w2.shape[1]
    # The VPU/XLU formulation is mathematically specialized; general F/O would
    # need an MXU path.
    assert F == 1 and O == 1, "kernel specialized for n_feature = n_output = 1"

    # --- pack all parameters into one (Hp, 4) tile: 1 operand, 1 DMA ---------
    Hp = max(_CHUNK, ((H + _CHUNK - 1) // _CHUNK) * _CHUNK)
    params = jnp.zeros((Hp, 4), jnp.float32)
    params = params.at[:H, 0].set(w1.astype(jnp.float32).reshape(H))
    params = params.at[:H, 1].set(b1.astype(jnp.float32).reshape(H))
    params = params.at[:H, 2].set(w2.astype(jnp.float32).reshape(H))
    params = params.at[0, 3].set(b2.astype(jnp.float32).reshape(()))
    # (padded rows are all-zero: relu(0*x+0) = 0 and 0*0 = 0 -> no contribution)

    # Batch on the lane axis; F == 1 so this reshape is the transpose.
    x_t = x.astype(jnp.float32).reshape(1, B)

    flops = 2 * B * (F * H + H * O) + 2 * B * H
    bytes_accessed = 4 * (2 * B + Hp * 4)
    ce = pl.CostEstimate(flops=flops, transcendentals=0,
                         bytes_accessed=bytes_accessed)
    vmem_spec = pl.BlockSpec(memory_space=pltpu.MemorySpace.VMEM)

    if B <= lane_tile:
        # Small batch: single invocation, no grid, no pad/unpad round-trip.
        out_t = pl.pallas_call(
            _mlp_kernel,
            out_shape=jax.ShapeDtypeStruct((1, B), jnp.float32),
            in_specs=[vmem_spec, vmem_spec],
            out_specs=vmem_spec,
            cost_estimate=ce,
        )(x_t, params)
    else:
        # Large batch: tile the lane axis; "parallel" lets v7x's two
        # TensorCores split the batch.
        B_pad = ((B + lane_tile - 1) // lane_tile) * lane_tile
        x_p = jnp.pad(x_t, ((0, 0), (0, B_pad - B)))
        out_t = pl.pallas_call(
            _mlp_kernel,
            out_shape=jax.ShapeDtypeStruct((1, B_pad), jnp.float32),
            grid=(B_pad // lane_tile,),
            in_specs=[
                pl.BlockSpec((1, lane_tile), lambda i: (0, i)),
                pl.BlockSpec((Hp, 4), lambda i: (0, 0)),
            ],
            out_specs=pl.BlockSpec((1, lane_tile), lambda i: (0, i)),
            compiler_params=pltpu.CompilerParams(
                dimension_semantics=("parallel",)),
            cost_estimate=ce,
        )(x_p, params)
        # Padded columns hold relu(b1)*w2 + b2 garbage -> must be dropped.
        out_t = out_t[:, :B]

    return out_t.reshape(B, O).astype(x.dtype)


def _init_params(key, n_feature, n_hidden, n_output):
    # Deterministic init mimicking torch.nn.Linear's U(-1/sqrt(in), 1/sqrt(in)).
    k1, k2, k3, k4 = jax.random.split(key, 4)
    lim1 = 1.0 / (n_feature ** 0.5)
    lim2 = 1.0 / (n_hidden ** 0.5)
    w1 = jax.random.uniform(k1, (n_feature, n_hidden), jnp.float32, -lim1, lim1)
    b1 = jax.random.uniform(k2, (1, n_hidden), jnp.float32, -lim1, lim1)
    w2 = jax.random.uniform(k3, (n_hidden, n_output), jnp.float32, -lim2, lim2)
    b2 = jax.random.uniform(k4, (1, n_output), jnp.float32, -lim2, lim2)
    return w1, b1, w2, b2


def _reference(x, w1, b1, w2, b2):
    return jnp.maximum(x @ w1 + b1, 0.0) @ w2 + b2


if __name__ == "__main__":
    n_feature, n_hidden, n_output = 1, 32, 1
    key = jax.random.PRNGKey(0)
    w1, b1, w2, b2 = _init_params(key, n_feature, n_hidden, n_output)

    # Shapes from the reference script: x = linspace(-pi, pi, 400).unsqueeze(1)
    B = 400
    x = jnp.linspace(-jnp.pi, jnp.pi, B, dtype=jnp.float32).reshape(B, n_feature)
    y = jax.block_until_ready(net_forward(x, w1, b1, w2, b2))
    assert y.shape == (B, n_output)
    assert jnp.allclose(y, _reference(x, w1, b1, w2, b2), atol=1e-5, rtol=1e-5), \
        "small-batch path mismatch vs reference"

    # Also exercise the tiled / parallel-grid large-batch path once.
    B2 = 4500
    x2 = jnp.linspace(-jnp.pi, jnp.pi, B2, dtype=jnp.float32).reshape(B2, n_feature)
    y2 = jax.block_until_ready(net_forward(x2, w1, b1, w2, b2))
    assert y2.shape == (B2, n_output)
    assert jnp.allclose(y2, _reference(x2, w1, b1, w2, b2), atol=1e-5, rtol=1e-5), \
        "tiled path mismatch vs reference"

    print("KERNEL_OK")
</pallas_src>

<mosaic_0001>
module attributes {stable_mosaic.version = 11 : i64} {
  func.func @_mlp_kernel(%arg0: memref<1x400xf32, #tpu.memory_space<vmem>>, %arg1: memref<32x4xf32, #tpu.memory_space<vmem>>, %arg2: memref<1x400xf32, #tpu.memory_space<vmem>>) attributes {dimension_semantics = [], scalar_prefetch = 0 : i64, scratch_operands = 0 : i64, tpu.core_type = #tpu.core_type<tc>} {
    %c0 = arith.constant 0 : index
    %c0_0 = arith.constant 0 : index
    %0 = vector.load %arg0[%c0, %c0_0] : memref<1x400xf32, #tpu.memory_space<vmem>>, vector<1x400xf32>
    %cst = arith.constant 0.000000e+00 : f32
    %1 = vector.broadcast %cst : f32 to vector<1x400xf32>
    %c0_i32 = arith.constant 0 : i32
    %c8_i32 = arith.constant 8 : i32
    %2 = arith.muli %c0_i32, %c8_i32 : i32
    %3 = tpu.assume_multiple %2, 8 : i32
    %4 = arith.index_cast %3 : i32 to index
    %c0_1 = arith.constant 0 : index
    %5 = vector.load %arg1[%4, %c0_1] : memref<32x4xf32, #tpu.memory_space<vmem>>, vector<8x4xf32>
    %6 = vector.extract_strided_slice %5 {offsets = [0, 0], sizes = [8, 1], strides = [1, 1]} : vector<8x4xf32> to vector<8x1xf32>
    %7 = vector.extract_strided_slice %5 {offsets = [0, 1], sizes = [8, 1], strides = [1, 1]} : vector<8x4xf32> to vector<8x1xf32>
    %8 = vector.extract_strided_slice %5 {offsets = [0, 2], sizes = [8, 1], strides = [1, 1]} : vector<8x4xf32> to vector<8x1xf32>
    %9 = vector.broadcast %6 : vector<8x1xf32> to vector<8x400xf32>
    %10 = vector.broadcast %0 : vector<1x400xf32> to vector<8x400xf32>
    %11 = arith.mulf %9, %10 : vector<8x400xf32>
    %12 = vector.broadcast %7 : vector<8x1xf32> to vector<8x400xf32>
    %13 = arith.addf %11, %12 : vector<8x400xf32>
    %cst_2 = arith.constant 0.000000e+00 : f32
    %14 = vector.broadcast %cst_2 : f32 to vector<8x400xf32>
    %15 = arith.maximumf %13, %14 : vector<8x400xf32>
    %16 = vector.broadcast %8 : vector<8x1xf32> to vector<8x400xf32>
    %17 = arith.mulf %16, %15 : vector<8x400xf32>
    %cst_3 = arith.constant dense<0.000000e+00> : vector<400xf32>
    %18 = vector.multi_reduction <add>, %17, %cst_3 [0] : vector<8x400xf32> to vector<400xf32>
    %19 = vector.shape_cast %18 : vector<400xf32> to vector<1x400xf32>
    %20 = arith.addf %1, %19 : vector<1x400xf32>
    %c1_i32 = arith.constant 1 : i32
    %c8_i32_4 = arith.constant 8 : i32
    %21 = arith.muli %c1_i32, %c8_i32_4 : i32
    %22 = tpu.assume_multiple %21, 8 : i32
    %23 = arith.index_cast %22 : i32 to index
    %c0_5 = arith.constant 0 : index
    %24 = vector.load %arg1[%23, %c0_5] : memref<32x4xf32, #tpu.memory_space<vmem>>, vector<8x4xf32>
    %25 = vector.extract_strided_slice %24 {offsets = [0, 0], sizes = [8, 1], strides = [1, 1]} : vector<8x4xf32> to vector<8x1xf32>
    %26 = vector.extract_strided_slice %24 {offsets = [0, 1], sizes = [8, 1], strides = [1, 1]} : vector<8x4xf32> to vector<8x1xf32>
    %27 = vector.extract_strided_slice %24 {offsets = [0, 2], sizes = [8, 1], strides = [1, 1]} : vector<8x4xf32> to vector<8x1xf32>
    %28 = vector.broadcast %25 : vector<8x1xf32> to vector<8x400xf32>
    %29 = vector.broadcast %0 : vector<1x400xf32> to vector<8x400xf32>
    %30 = arith.mulf %28, %29 : vector<8x400xf32>
    %31 = vector.broadcast %26 : vector<8x1xf32> to vector<8x400xf32>
    %32 = arith.addf %30, %31 : vector<8x400xf32>
    %cst_6 = arith.constant 0.000000e+00 : f32
    %33 = vector.broadcast %cst_6 : f32 to vector<8x400xf32>
    %34 = arith.maximumf %32, %33 : vector<8x400xf32>
    %35 = vector.broadcast %27 : vector<8x1xf32> to vector<8x400xf32>
    %36 = arith.mulf %35, %34 : vector<8x400xf32>
    %cst_7 = arith.constant dense<0.000000e+00> : vector<400xf32>
    %37 = vector.multi_reduction <add>, %36, %cst_7 [0] : vector<8x400xf32> to vector<400xf32>
    %38 = vector.shape_cast %37 : vector<400xf32> to vector<1x400xf32>
    %39 = arith.addf %20, %38 : vector<1x400xf32>
    %c2_i32 = arith.constant 2 : i32
    %c8_i32_8 = arith.constant 8 : i32
    %40 = arith.muli %c2_i32, %c8_i32_8 : i32
    %41 = tpu.assume_multiple %40, 8 : i32
    %42 = arith.index_cast %41 : i32 to index
    %c0_9 = arith.constant 0 : index
    %43 = vector.load %arg1[%42, %c0_9] : memref<32x4xf32, #tpu.memory_space<vmem>>, vector<8x4xf32>
    %44 = vector.extract_strided_slice %43 {offsets = [0, 0], sizes = [8, 1], strides = [1, 1]} : vector<8x4xf32> to vector<8x1xf32>
    %45 = vector.extract_strided_slice %43 {offsets = [0, 1], sizes = [8, 1], strides = [1, 1]} : vector<8x4xf32> to vector<8x1xf32>
    %46 = vector.extract_strided_slice %43 {offsets = [0, 2], sizes = [8, 1], strides = [1, 1]} : vector<8x4xf32> to vector<8x1xf32>
    %47 = vector.broadcast %44 : vector<8x1xf32> to vector<8x400xf32>
    %48 = vector.broadcast %0 : vector<1x400xf32> to vector<8x400xf32>
    %49 = arith.mulf %47, %48 : vector<8x400xf32>
    %50 = vector.broadcast %45 : vector<8x1xf32> to vector<8x400xf32>
    %51 = arith.addf %49, %50 : vector<8x400xf32>
    %cst_10 = arith.constant 0.000000e+00 : f32
    %52 = vector.broadcast %cst_10 : f32 to vector<8x400xf32>
    %53 = arith.maximumf %51, %52 : vector<8x400xf32>
    %54 = vector.broadcast %46 : vector<8x1xf32> to vector<8x400xf32>
    %55 = arith.mulf %54, %53 : vector<8x400xf32>
    %cst_11 = arith.constant dense<0.000000e+00> : vector<400xf32>
    %56 = vector.multi_reduction <add>, %55, %cst_11 [0] : vector<8x400xf32> to vector<400xf32>
    %57 = vector.shape_cast %56 : vector<400xf32> to vector<1x400xf32>
    %58 = arith.addf %39, %57 : vector<1x400xf32>
    %c3_i32 = arith.constant 3 : i32
    %c8_i32_12 = arith.constant 8 : i32
    %59 = arith.muli %c3_i32, %c8_i32_12 : i32
    %60 = tpu.assume_multiple %59, 8 : i32
    %61 = arith.index_cast %60 : i32 to index
    %c0_13 = arith.constant 0 : index
    %62 = vector.load %arg1[%61, %c0_13] : memref<32x4xf32, #tpu.memory_space<vmem>>, vector<8x4xf32>
    %63 = vector.extract_strided_slice %62 {offsets = [0, 0], sizes = [8, 1], strides = [1, 1]} : vector<8x4xf32> to vector<8x1xf32>
    %64 = vector.extract_strided_slice %62 {offsets = [0, 1], sizes = [8, 1], strides = [1, 1]} : vector<8x4xf32> to vector<8x1xf32>
    %65 = vector.extract_strided_slice %62 {offsets = [0, 2], sizes = [8, 1], strides = [1, 1]} : vector<8x4xf32> to vector<8x1xf32>
    %66 = vector.broadcast %63 : vector<8x1xf32> to vector<8x400xf32>
    %67 = vector.broadcast %0 : vector<1x400xf32> to vector<8x400xf32>
    %68 = arith.mulf %66, %67 : vector<8x400xf32>
    %69 = vector.broadcast %64 : vector<8x1xf32> to vector<8x400xf32>
    %70 = arith.addf %68, %69 : vector<8x400xf32>
    %cst_14 = arith.constant 0.000000e+00 : f32
    %71 = vector.broadcast %cst_14 : f32 to vector<8x400xf32>
    %72 = arith.maximumf %70, %71 : vector<8x400xf32>
    %73 = vector.broadcast %65 : vector<8x1xf32> to vector<8x400xf32>
    %74 = arith.mulf %73, %72 : vector<8x400xf32>
    %cst_15 = arith.constant dense<0.000000e+00> : vector<400xf32>
    %75 = vector.multi_reduction <add>, %74, %cst_15 [0] : vector<8x400xf32> to vector<400xf32>
    %76 = vector.shape_cast %75 : vector<400xf32> to vector<1x400xf32>
    %77 = arith.addf %58, %76 : vector<1x400xf32>
    %c4_i32 = arith.constant 4 : i32
    %c0_16 = arith.constant 0 : index
    %c3 = arith.constant 3 : index
    %78 = vector.load %arg1[%c0_16, %c3] : memref<32x4xf32, #tpu.memory_space<vmem>>, vector<1x1xf32>
    %79 = vector.broadcast %78 : vector<1x1xf32> to vector<1x400xf32>
    %80 = arith.addf %77, %79 : vector<1x400xf32>
    %c0_17 = arith.constant 0 : index
    %c0_18 = arith.constant 0 : index
    %81 = vector.load %arg2[%c0_17, %c0_18] : memref<1x400xf32, #tpu.memory_space<vmem>>, vector<1x400xf32>
    tpu.vector_store %arg2[%c0_17, %c0_18], %80 {strides = array<i32>} : memref<1x400xf32, #tpu.memory_space<vmem>>, vector<1x400xf32>,
    return
  }
}

</mosaic_0001>

<bundles_post_ra>
// kernel: tpu_custom_call.1
= control target key start
LH: loop header
LB: loop body
LE: loop exit
PB: predicated region body
PF: predicated region fallthrough
CT: control target
= control target key end

     0   :  { %v373_v1 = vmov 1   ;;  %v374_v2 = vmov 0   ;;  %s469_s0 = inlined_call_operand.vmem [shape: f32[1,400], index: 0, kind: input, shape index: {}]   ;;  %s470_s1 = inlined_call_operand.vmem [shape: f32[32,4], index: 1, kind: input, shape index: {}]   ;;  %s471_s2 = inlined_call_operand.hbm [shape: f32[1,400], index: 2, kind: output, shape index: {}]  }
   0x1   :  { %v13_v0 = vld [vmem:[%s470_s1] sm:$0xff]  ;;  %342 = vset.pattern.permute.xlu1 %v373_v1  ;;  %341 = vset.pattern.permute.xlu0 %v374_v2 }
   0x2   :  { %45 = vperm.xlu1 %342, %v13_v0   ;;  %16 = vperm.xlu0 %341, %v13_v0  }
   0x3   :  { %7 = vsyncpa [#allocation3], 0  ;;  %v332_v3 = vld [vmem:[%s470_s1 + $0x8] sm:$0xff]  ;;  %v333_v4 = vld [vmem:[%s470_s1 + $0x10] sm:$0xff]  ;;  %v375_v6 = vmov 2   ;;  %v376_v8 = vmov 3   ;;  %v20_v9 = vlaneseq }
   0x4   :  { %v334_v5 = vld [vmem:[%s470_s1 + $0x18] sm:$0xff]  ;;  %v274_v7 = vld [vmem:[%s470_s1] sm:$0x1]  ;;  %vm82_vm0 = vcmask 130048  }
   0x5   :  { %v410_v10 = vshrl.u32 %v20_v9, 7  ;;  %v12_v15 = vld [vmem:[%s469_s0] sm:$0xf]  ;;  %s378_s0 = smov [#allocation2]   ;;  %vm315_vm1 = vcmp.lt.s32.totalorder %v20_v9, 400 }
   0x6   :  { %106 = vperm.xlu1 %342, %v332_v3   ;;  %98 = vperm.xlu0 %341, %v332_v3   ;;  %s324_s1 = sshll.u32 %s378_s0, 4  ;;  %s325_s1 = int_to_ptr.vmem [resolvable:$true] %s324_s1 }
   0x7   :  { %v22_v11 = vsub.s32 0, %v410_v10  ;;  %v26_v12 = vsub.s32 1, %v410_v10  ;;  %v30_v13 = vsub.s32 2, %v410_v10  ;;  %v34_v14 = vsub.s32 3, %v410_v10  ;;  %s349_s21 = scalar_lea.vmem %s325_s1, 64  ;;  %p354_p1 = scmp.lt.s32.totalorder %s325_s1, %s325_s1 }
   0x8   :  { %p350_p0 = scmp.ne.s32.totalorder %s325_s1, %s349_s21  ;;  %p355_p2 = scmp.lt.s32.totalorder %s349_s21, %s349_s21 }
   0x9   :  { %v23_v18 = vrot.slane %v12_v15, %v22_v11  ;;  %v27_v19 = vrot.slane %v12_v15, %v26_v12  ;;  %v31_v20 = vrot.slane %v12_v15, %v30_v13  ;;  %v35_v21 = vrot.slane %v12_v15, %v34_v14 }
   0xa   :  { %166 = vperm.xlu1 %342, %v333_v4   ;;  %158 = vperm.xlu0 %341, %v333_v4   ;;  %p356_p3 = por %p355_p2, %p354_p1 }
   0xc   :  { %p357_p4 = pnand %p356_p3, %p350_p0 }
   0xe   :  { %343 = vset.pattern.permute.xlu1 %v375_v6  ;;  %218 = vperm.xlu0 %341, %v334_v5  }
   0xf   :  { %57 = vperm.xlu1 %343, %v13_v0  }
  0x12   :  { %344 = vset.pattern.permute.xlu0 %v375_v6 }
  0x13   :  { %345 = vset.pattern.permute.xlu1 %v373_v1  ;;  %118 = vperm.xlu0 %344, %v332_v3  }
  0x14   :  { %226 = vperm.xlu1 %345, %v334_v5  }
  0x17   :  { %238 = vperm.xlu0 %344, %v334_v5  }
  0x18   :  { %346 = vset.pattern.permute.xlu1 %v375_v6 }
  0x19   :  { %178 = vperm.xlu1 %346, %v333_v4  }
  0x1b   :  { %348 = vset.pattern.permute.xlu0 %v376_v8 }
  0x1d   :  { %347 = vset.pattern.permute.xlu1 %v376_v8 }
  0x1e   :  { %277 = vperm.xlu1 %347, %v274_v7  }
  0x81   :  { %v46_v16 = vpop.permute.xlu1 %45  ;;  %v17_v17 = vpop.permute.xlu0 %16 }
  0x82   :  { %v40_v24 = vmul.f32 %v23_v18, %v17_v17  ;;  %v41_v25 = vmul.f32 %v27_v19, %v17_v17  ;;  %v42_v26 = vmul.f32 %v31_v20, %v17_v17  ;;  %v43_v27 = vmul.f32 %v35_v21, %v17_v17 }
  0x84   :  { %v48_v33 = vadd.f32 %v46_v16, %v40_v24  ;;  %v49_v34 = vadd.f32 %v46_v16, %v41_v25  ;;  %v50_v35 = vadd.f32 %v46_v16, %v42_v26  ;;  %v51_v36 = vadd.f32 %v46_v16, %v43_v27 }
  0x85   :  { %v107_v22 = vpop.permute.xlu1 %106  ;;  %v99_v23 = vpop.permute.xlu0 %98 }
  0x86   :  { %v101_v28 = vmul.f32 %v99_v23, %v23_v18  ;;  %v102_v29 = vmul.f32 %v99_v23, %v27_v19  ;;  %v103_v30 = vmul.f32 %v99_v23, %v31_v20  ;;  %v104_v37 = vmul.f32 %v99_v23, %v35_v21 }
  0x87   :  { %v52_v46 = vmax.f32 %v48_v33, 0.0  ;;  %v53_v47 = vmax.f32 %v49_v34, 0.0  ;;  %v54_v49 = vmax.f32 %v50_v35, 0.0  ;;  %v55_v50 = vmax.f32 %v51_v36, 0.0 }
  0x88   :  { %v419_v38 = vadd.f32 %v107_v22, %v101_v28  ;;  %v421_v41 = vadd.f32 %v107_v22, %v102_v29  ;;  %v423_v42 = vadd.f32 %v107_v22, %v103_v30  ;;  %v425_v51 = vadd.f32 %v107_v22, %v104_v37 }
  0x89   :  { %v167_v31 = vpop.permute.xlu1 %166  ;;  %v159_v32 = vpop.permute.xlu0 %158 }
  0x8a   :  { %v161_v39 = vmul.f32 %v159_v32, %v23_v18  ;;  %v162_v40 = vmul.f32 %v159_v32, %v27_v19  ;;  %v163_v44 = vmul.f32 %v159_v32, %v31_v20  ;;  %v164_v45 = vmul.f32 %v159_v32, %v35_v21 }
  0x8b   :  { %v113_v52 = vmax.f32 %v419_v38, 0.0  ;;  %v114_v55 = vmax.f32 %v421_v41, 0.0  ;;  %v115_v56 = vmax.f32 %v423_v42, 0.0 }
  0x8c   :  { %v169_v53 = vadd.f32 %v167_v31, %v161_v39  ;;  %v170_v54 = vadd.f32 %v167_v31, %v162_v40  ;;  %v171_v63 = vadd.f32 %v167_v31, %v163_v44  ;;  %v172_v0 = vadd.f32 %v167_v31, %v164_v45 }
  0x8d   :  { %v219_v43 = vpop.permute.xlu0 %218 }
  0x8e   :  { %v58_v48 = vpop.permute.xlu1 %57  ;;  %v221_v61 = vmul.f32 %v219_v43, %v23_v18  ;;  %v222_v62 = vmul.f32 %v219_v43, %v27_v19  ;;  %v223_v2 = vmul.f32 %v219_v43, %v31_v20  ;;  %v224_v3 = vmul.f32 %v219_v43, %v35_v21 }
  0x8f   :  { %v60_v57 = vmul.f32 %v58_v48, %v52_v46  ;;  %v61_v58 = vmul.f32 %v58_v48, %v53_v47  ;;  %v62_v59 = vmul.f32 %v58_v48, %v54_v49  ;;  %v63_v60 = vmul.f32 %v58_v48, %v55_v50 }
  0x90   :  { %v173_v7 = vmax.f32 %v169_v53, 0.0  ;;  %v174_v17 = vmax.f32 %v170_v54, 0.0  ;;  %v175_v18 = vmax.f32 %v171_v63, 0.0  ;;  %v176_v19 = vmax.f32 %v172_v0, 0.0 }
  0x91   :  { %v64_v4 = vrot.slane %v60_v57, 4  ;;  %v83_v5 = vsel %vm82_vm0, %v63_v60, 0.0  ;;  %v70_v8 = vrot.slane %v61_v58, 4  ;;  %v76_v11 = vrot.slane %v62_v59, 4 }
  0x92   :  { %v430_v1 = vpop.permute.xlu0 %118  ;;  %v84_v12 = vrot.slane %v83_v5, 4 }
  0x93   :  { %v227_v6 = vpop.permute.xlu1 %226  ;;  %v65_v22 = vadd.f32 %v64_v4, %v60_v57  ;;  %v71_v27 = vadd.f32 %v70_v8, %v61_v58  ;;  %v77_v28 = vadd.f32 %v76_v11, %v62_v59  ;;  %v116_v4 = vmax.f32 %v425_v51, 0.0 }
  0x94   :  { %v229_v13 = vadd.f32 %v227_v6, %v221_v61  ;;  %v230_v14 = vadd.f32 %v227_v6, %v222_v62  ;;  %v231_v15 = vadd.f32 %v227_v6, %v223_v2  ;;  %v232_v16 = vadd.f32 %v227_v6, %v224_v3 }
  0x95   :  { %v66_v26 = vrot.slane %v65_v22, 2  ;;  %v85_v29 = vadd.f32 %v84_v12, %v83_v5  ;;  %v72_v3 = vrot.slane %v71_v27, 2  ;;  %v121_v5 = vmul.f32 %v430_v1, %v113_v52 }
  0x96   :  { %v239_v23 = vpop.permute.xlu0 %238  ;;  %v233_v24 = vmax.f32 %v229_v13, 0.0  ;;  %v234_v20 = vmax.f32 %v230_v14, 0.0  ;;  %v235_v21 = vmax.f32 %v231_v15, 0.0  ;;  %v236_v25 = vmax.f32 %v232_v16, 0.0 }
  0x97   :  { %v122_v6 = vmul.f32 %v430_v1, %v114_v55  ;;  %v78_v14 = vrot.slane %v77_v28, 2  ;;  %v86_v15 = vrot.slane %v85_v29, 2  ;;  %v123_v16 = vmul.f32 %v430_v1, %v115_v56 }
  0x98   :  { %v241_v30 = vmul.f32 %v239_v23, %v233_v24  ;;  %v242_v31 = vmul.f32 %v239_v23, %v234_v20  ;;  %v243_v32 = vmul.f32 %v239_v23, %v235_v21  ;;  %v244_v33 = vmul.f32 %v239_v23, %v236_v25  ;;  %v179_v34 = vpop.permute.xlu1 %178 }
  0x99   :  { %v181_v35 = vmul.f32 %v179_v34, %v173_v7  ;;  %v182_v36 = vmul.f32 %v179_v34, %v174_v17  ;;  %v183_v37 = vmul.f32 %v179_v34, %v175_v18  ;;  %v184_v39 = vmul.f32 %v179_v34, %v176_v19 }
  0x9a   :  { %v245_v40 = vrot.slane %v241_v30, 4  ;;  %v251_v43 = vrot.slane %v242_v31, 4  ;;  %v257_v44 = vrot.slane %v243_v32, 4  ;;  %v263_v45 = vsel %vm82_vm0, %v244_v33, 0.0 }
  0x9b   :  { %v264_v46 = vrot.slane %v263_v45, 4  ;;  %v185_v47 = vrot.slane %v181_v35, 4  ;;  %v191_v48 = vrot.slane %v182_v36, 4  ;;  %v197_v49 = vrot.slane %v183_v37, 4 }
  0x9c   :  { %v246_v50 = vadd.f32 %v245_v40, %v241_v30  ;;  %v252_v53 = vadd.f32 %v251_v43, %v242_v31  ;;  %v258_v54 = vadd.f32 %v257_v44, %v243_v32  ;;  %v203_v57 = vsel %vm82_vm0, %v184_v39, 0.0 }
  0x9d   :  { %v265_v58 = vadd.f32 %v264_v46, %v263_v45  ;;  %v186_v59 = vadd.f32 %v185_v47, %v181_v35  ;;  %v192_v60 = vadd.f32 %v191_v48, %v182_v36  ;;  %v198_v61 = vadd.f32 %v197_v49, %v183_v37 }
  0x9e   :  { %v247_v62 = vrot.slane %v246_v50, 2  ;;  %v253_v63 = vrot.slane %v252_v53, 2  ;;  %v259_v0 = vrot.slane %v258_v54, 2  ;;  %v204_v2 = vrot.slane %v203_v57, 4 }
  0x9f   :  { %v266_v7 = vrot.slane %v265_v58, 2  ;;  %v187_v8 = vrot.slane %v186_v59, 2  ;;  %v193_v11 = vrot.slane %v192_v60, 2  ;;  %v199_v13 = vrot.slane %v198_v61, 2 }
  0xa0   :  { %v205_v12 = vadd.f32 %v204_v2, %v203_v57  ;;  %v248_v51 = vadd.f32 %v247_v62, %v246_v50  ;;  %v254_v17 = vadd.f32 %v253_v63, %v252_v53  ;;  %v445_v38 = vadd.f32 %v259_v0, %v258_v54 }
  0xa1   :  { %v67_v52 = vadd.f32 %v66_v26, %v65_v22  ;;  %v73_v18 = vadd.f32 %v72_v3, %v71_v27  ;;  %v124_v41 = vmul.f32 %v430_v1, %v116_v4  ;;  %v125_v55 = vrot.slane %v121_v5, 4 }
  0xa2   :  { %v131_v19 = vrot.slane %v122_v6, 4  ;;  %v448_v23 = vadd.f32 %v266_v7, %v265_v58  ;;  %v188_v24 = vadd.f32 %v187_v8, %v186_v59  ;;  %v194_v20 = vadd.f32 %v193_v11, %v192_v60 }
  0xa3   :  { %v206_v21 = vrot.slane %v205_v12, 2  ;;  %v79_v25 = vadd.f32 %v78_v14, %v77_v28  ;;  %v126_v30 = vadd.f32 %v125_v55, %v121_v5  ;;  %v137_v31 = vrot.slane %v123_v16, 4 }
  0xa4   :  { %v132_v42 = vadd.f32 %v131_v19, %v122_v6  ;;  %v200_v56 = vadd.f32 %v199_v13, %v198_v61  ;;  %v68_v32 = vrot.slane %v67_v52, 1  ;;  %v87_v33 = vadd.f32 %v86_v15, %v85_v29 }
  0xa5   :  { %v143_v34 = vsel %vm82_vm0, %v124_v41, 0.0  ;;  %v74_v22 = vrot.slane %v73_v18, 1  ;;  %v127_v26 = vrot.slane %v126_v30, 2  ;;  %v138_v1 = vadd.f32 %v137_v31, %v123_v16  ;;  %v278_v41 = vpop.permute.xlu1 %277 }
  0xa6   :  { %v133_v27 = vrot.slane %v132_v42, 2  ;;  %v207_v35 = vadd.f32 %v206_v21, %v205_v12  ;;  %v144_v36 = vrot.slane %v143_v34, 4  ;;  %v189_v37 = vrot.slane %v188_v24, 1 }
  0xa7   :  { %v195_v39 = vrot.slane %v194_v20, 1  ;;  %v80_v40 = vrot.slane %v79_v25, 1  ;;  %v128_v43 = vadd.f32 %v127_v26, %v126_v30  ;;  %v139_v28 = vrot.slane %v138_v1, 2 }
  0xa8   :  { %v134_v44 = vadd.f32 %v133_v27, %v132_v42  ;;  %v69_v45 = vadd.f32 %v68_v32, %v67_v52  ;;  %v88_v46 = vrot.slane %v87_v33, 1  ;;  %v145_v47 = vadd.f32 %v144_v36, %v143_v34 }
  0xa9   :  { %v201_v48 = vrot.slane %v200_v56, 1  ;;  %v75_v49 = vadd.f32 %v74_v22, %v73_v18  ;;  %v129_v29 = vrot.slane %v128_v43, 1  ;;  %v140_v53 = vadd.f32 %v139_v28, %v138_v1 }
  0xaa   :  { %v135_v50 = vrot.slane %v134_v44, 1  ;;  %v146_v54 = vrot.slane %v145_v47, 2  ;;  %v190_v57 = vadd.f32 %v189_v37, %v188_v24  ;;  %v196_v58 = vadd.f32 %v195_v39, %v194_v20 }
  0xab   :  { %v249_v59 = vrot.slane %v248_v51, 1  ;;  %v130_v60 = vadd.f32 %v129_v29, %v128_v43  ;;  %v141_v62 = vrot.slane %v140_v53, 1  ;;  %v255_v63 = vrot.slane %v254_v17, 1 }
  0xac   :  { %v136_v61 = vadd.f32 %v135_v50, %v134_v44  ;;  %v81_v0 = vadd.f32 %v80_v40, %v79_v25  ;;  %v147_v2 = vadd.f32 %v146_v54, %v145_v47  ;;  %v202_v3 = vadd.f32 %v201_v48, %v200_v56 }
  0xad   :  { %v208_v4 = vrot.slane %v207_v35, 1  ;;  %v142_v5 = vadd.f32 %v141_v62, %v140_v53  ;;  %v150_v6 = vadd.f32 %v130_v60, %v69_v45  ;;  %v261_v8 = vrot.slane %v445_v38, 1 }
  0xae   :  { %v151_v7 = vadd.f32 %v136_v61, %v75_v49  ;;  %v377_v11 = vmov 1966171168   ;;  %v148_v13 = vrot.slane %v147_v2, 1  ;;  %v250_v14 = vadd.f32 %v249_v59, %v248_v51 }
  0xaf   :  { %v291_v12 = vunpack.c.l.s4 %v377_v11  ;;  %v152_v15 = vadd.f32 %v142_v5, %v81_v0  ;;  %v210_v16 = vadd.f32 %v190_v57, %v150_v6  ;;  %v256_v18 = vadd.f32 %v255_v63, %v254_v17 }
  0xb0   :  { %v211_v52 = vadd.f32 %v196_v58, %v151_v7  ;;  %v89_v55 = vadd.f32 %v88_v46, %v87_v33  ;;  %v149_v19 = vadd.f32 %v148_v13, %v147_v2  ;;  %v209_v24 = vadd.f32 %v208_v4, %v207_v35 }
  0xb1   :  { %v268_v20 = vrot.slane %v448_v23, 1  ;;  %v212_v21 = vadd.f32 %v202_v3, %v152_v15  ;;  %v262_v25 = vadd.f32 %v261_v8, %v445_v38  ;;  %v270_v30 = vadd.f32 %v250_v14, %v210_v16 }
  0xb2   :  { %v271_v42 = vadd.f32 %v256_v18, %v211_v52  ;;  %v292_v31 = vunpack.c.0.s8 %v291_v12  ;;  %v153_v56 = vadd.f32 %v149_v19, %v89_v55 }
  0xb3   :  { %v272_v32 = vadd.f32 %v262_v25, %v212_v21  ;;  %v280_v34 = vadd.f32 %v278_v41, %v270_v30  ;;  %v269_v26 = vadd.f32 %v268_v20, %v448_v23 }
  0xb4   :  { %v281_v51 = vadd.f32 %v278_v41, %v271_v42  ;;  %v213_v22 = vadd.f32 %v209_v24, %v153_v56  ;;  %v295_v17 = vsub.s32 %v292_v31, %v410_v10 }
  0xb5   :  { %v282_v27 = vadd.f32 %v278_v41, %v272_v32 }
  0xb6   :  { %v273_v33 = vadd.f32 %v269_v26, %v213_v22  ;;  %v288_v1 = vcombine.low %v280_v34, %v281_v51 }
  0xb8   :  { %v283_v35 = vadd.f32 %v278_v41, %v273_v33  ;;  %v296_v37 = vrot.slane %v288_v1, %v295_v17 }
  0xba   :  { %v289_v36 = vcombine.low %v282_v27, %v283_v35 }
  0xbc   :  { %v303_v39 = vrot.slane %v289_v36, %v295_v17 }
  0xbe   :  { %v304_v38 = vcombine.low %v296_v37, %v303_v39 }
  0xc0   :  { %v311_v40 = vrot.slane %v304_v38, %v295_v17 }
  0xc2   :  { %317 = vst.msk [vmem:[#allocation2] sm:$0xf] %vm315_vm1, %v311_v40 }
  0xc3   :  { %360 = shalt.err (!%p357_p4)
}
  0xc4   :  { %s361_s24 = scalar_lea.hbm %s471_s2, 64 }
  0xc5   :  { %p362_p5 = scmp.ne.s32.totalorder %s471_s2, %s361_s24  ;;  %p365_p6 = scmp.lt.u32.totalorder %s361_s24, %s471_s2 }
  0xc7   :  { %p367_p7 = pnand %p365_p6, %p362_p5 }
  0xc9   :  { %370 = shalt.err (!%p367_p7)
}
  0xca   :  { %327 = dma.vmem_to_hbm [thread:$0]  %s325_s1, 64, %s471_s2, [#allocation3]  }
  0xcb   :  { %371 = dma.done.wait [#allocation3], 64  }
  0xcc   :  { %372 = vsyncadd [#allocation3], 4294967232 }
  0xcd   :  { %331 = vsyncpa [#allocation3], 1 }

</bundles_post_ra>
